<compile_context>
chip_gen: v6e
topology: v6e:2x2x1
jax: 0.10.0
libtpu: 0.0.40
codegen_flags: <defaults>
</compile_context>

<pallas_src>
from functools import partial

import numpy as np
import jax
import jax.numpy as jnp
from jax import lax
from jax.experimental import pallas as pl
from jax.experimental.pallas import tpu as pltpu

INTERMEDIATE_DIM = 64
IN_FEATURES = 784
SNR = 10.0  # dB, as in args.snr

K1, K2, K3 = 0.63576, 1.8732, 1.48695


def _round_up(n, m):
    return ((n + m - 1) // m) * m


def _transmitter_kernel(x_ref, wt_ref, s_ref, b2_ref, mask_ref,
                        z_ref, klrow_ref, *, noise_sq, log_noise_sq):
    # y = x @ W.T on the MXU with f32 accumulate.
    y = jnp.dot(x_ref[...], wt_ref[...], preferred_element_type=jnp.float32)

    # z = tanh(mu * ((x @ W.T + b) / l2))  ==  tanh(y * (mu/l2) + b*mu/l2)
    z = jnp.tanh(y * s_ref[...] + b2_ref[...])          # (TB, Dp)
    z_ref[...] = z

    # KL_log_uniform(noise^2 / (z^2 + 1e-4)), divide/softplus-free rewrite:
    #   log_a            = log(noise^2) - log(z^2 + 1e-4)
    #   softplus(-log_a) = log(noise^2 + z^2 + 1e-4) - log(noise^2)
    zsq = z * z
    log_a = log_noise_sq - jnp.log(zsq + 1e-4)
    softplus_neg = jnp.log(zsq + (noise_sq + 1e-4)) - log_noise_sq
    kl_term = K1 * jax.nn.sigmoid(K2 + K3 * log_a) - 0.5 * softplus_neg - K1
    # Zero lane-padded (j >= D) columns via the precomputed 0/1 mask.
    kl_term = kl_term * mask_ref[...]
    # Per-row partials; rows of a partial last block write out-of-bounds and
    # are dropped by Pallas, so no row mask is needed.
    klrow_ref[...] = jnp.sum(kl_term, axis=1, keepdims=True)   # (TB, 1)


def transmitter_forward(x, weight, bias, snr=SNR, stream_dtype=jnp.float32):
    B = x.shape[0]
    D, K = weight.shape
    x2 = x.reshape(B, -1).astype(stream_dtype)              # glue: (B, 784)

    Dp = _round_up(D, 128)                                   # lane-dense feature dim
    # Aim for ~8 grid steps (megacore sharding + double-buffered DMA overlap),
    # capped at 1024 rows (~6.5 MB double-buffered f32 x stream, well under the
    # 16 MiB v5e scoped-VMEM default).
    TB = min(1024, _round_up(pl.cdiv(B, 8), 8))
    num_blocks = pl.cdiv(B, TB)

    # Hoisted weight-only precompute (input independent).
    w = jnp.asarray(weight, jnp.float32)
    bv = jnp.asarray(bias, jnp.float32)
    inv_l2 = lax.rsqrt(jnp.sum(w * w, axis=1) + bv * bv)     # (D,)
    # mu = clamp(ones @ triu.T, 1e-4)  ->  mu[j] = D - j  (compile-time const)
    mu = jnp.maximum(jnp.float32(D) - jnp.arange(D, dtype=jnp.float32), 1e-4)
    s = mu * inv_l2                                          # (D,)
    b2 = bv * s                                              # (D,)

    # Lane-pad the weight-side operands to Dp columns.
    wt = jnp.zeros((K, Dp), stream_dtype).at[:, :D].set(w.T.astype(stream_dtype))
    s_p = jnp.zeros((1, Dp), jnp.float32).at[0, :D].set(s)
    b2_p = jnp.zeros((1, Dp), jnp.float32).at[0, :D].set(b2)
    mask_p = jnp.zeros((1, Dp), jnp.float32).at[0, :D].set(1.0)

    # SNR_to_noise (static config -> baked into the kernel as constants).
    noise_std = 1.0 / np.sqrt(2.0 * (10.0 ** (snr / 10.0)))
    noise_sq = float(noise_std * noise_std)
    log_noise_sq = float(np.log(noise_sq))

    kernel = partial(_transmitter_kernel,
                     noise_sq=noise_sq, log_noise_sq=log_noise_sq)

    z_pad, kl_rows = pl.pallas_call(
        kernel,
        out_shape=(jax.ShapeDtypeStruct((B, Dp), jnp.float32),
                   jax.ShapeDtypeStruct((B, 1), jnp.float32)),
        grid_spec=pltpu.PrefetchScalarGridSpec(
            num_scalar_prefetch=0,
            grid=(num_blocks,),
            in_specs=[
                pl.BlockSpec((TB, K), lambda i: (i, 0)),    # x tiles (streamed)
                pl.BlockSpec((K, Dp), lambda i: (0, 0)),    # weight.T (resident)
                pl.BlockSpec((1, Dp), lambda i: (0, 0)),    # mu/l2     (resident)
                pl.BlockSpec((1, Dp), lambda i: (0, 0)),    # b*mu/l2   (resident)
                pl.BlockSpec((1, Dp), lambda i: (0, 0)),    # lane mask (resident)
            ],
            out_specs=(
                pl.BlockSpec((TB, Dp), lambda i: (i, 0)),   # z tiles
                pl.BlockSpec((TB, 1), lambda i: (i, 0)),    # per-row KL partials
            )),
        compiler_params=pltpu.CompilerParams(
            dimension_semantics=("parallel",)),              # v7x: 2 TCs
    )(x2, wt, s_p, b2_p, mask_p)

    tx = z_pad[:, :D]
    kl = -jnp.sum(kl_rows) / B
    return tx, kl


def transmitter_reference(x, weight, bias, snr=SNR):
    """Pure-JAX reference mirroring the PyTorch forward."""
    B = x.shape[0]
    x2 = x.reshape(B, -1).astype(jnp.float32)
    l2 = jnp.sqrt(jnp.sum(weight ** 2, axis=1) + bias ** 2)
    w_n = weight / l2[:, None]
    b_n = bias / l2
    y = x2 @ w_n.T + b_n
    D = weight.shape[0]
    tri = jnp.triu(jnp.ones((D, D), jnp.float32))
    mu = jnp.maximum(jnp.ones((D,), jnp.float32) @ tri.T, 1e-4)
    z = jnp.tanh(mu * y)
    noise_std = 1.0 / np.sqrt(2.0 * (10.0 ** (snr / 10.0)))
    alpha_sq = (noise_std ** 2) / (z ** 2 + 1e-4)
    log_a = jnp.log(alpha_sq)
    kl_term = (K1 * jax.nn.sigmoid(K2 + K3 * log_a)
               - 0.5 * jax.nn.softplus(-log_a) - K1)
    return z, -jnp.sum(kl_term) / B


if __name__ == "__main__":
    key = jax.random.PRNGKey(0)
    kx, kw, kb = jax.random.split(key, 3)

    B = 2
    # Input consistent with fc1's 784 input features: (B, 1, 28, 28) NCHW.
    x = jax.random.normal(kx, (B, 1, 28, 28), dtype=jnp.float32)

    # Deterministic nn.Linear(784, D)-style init.
    bound = 1.0 / np.sqrt(IN_FEATURES)
    weight = jax.random.uniform(kw, (INTERMEDIATE_DIM, IN_FEATURES),
                                minval=-bound, maxval=bound, dtype=jnp.float32)
    bias = jax.random.uniform(kb, (INTERMEDIATE_DIM,),
                              minval=-bound, maxval=bound, dtype=jnp.float32)

    tx, kl = transmitter_forward(x, weight, bias, SNR)
    jax.block_until_ready((tx, kl))

    tx_ref, kl_ref = transmitter_reference(x, weight, bias, SNR)
    np.testing.assert_allclose(np.asarray(tx), np.asarray(tx_ref),
                               rtol=1e-3, atol=1e-3)
    np.testing.assert_allclose(np.asarray(kl), np.asarray(kl_ref),
                               rtol=1e-3, atol=1e-3)

    print("KERNEL_OK")
</pallas_src>

<mosaic_0001>
module attributes {stable_mosaic.version = 11 : i64} {
  func.func @_transmitter_kernel(%arg0: i32, %arg1: memref<8x784xf32, #tpu.memory_space<vmem>>, %arg2: memref<784x128xf32, #tpu.memory_space<vmem>>, %arg3: memref<1x128xf32, #tpu.memory_space<vmem>>, %arg4: memref<1x128xf32, #tpu.memory_space<vmem>>, %arg5: memref<1x128xf32, #tpu.memory_space<vmem>>, %arg6: memref<8x128xf32, #tpu.memory_space<vmem>>, %arg7: memref<8x1xf32, #tpu.memory_space<vmem>>) attributes {dimension_semantics = [#tpu.dimension_semantics<parallel>], iteration_bounds = array<i64: 1>, scalar_prefetch = 0 : i64, scratch_operands = 0 : i64, tpu.core_type = #tpu.core_type<tc>, window_params = [{transform_indices = @transform_0, window_bounds = array<i64: 8, 784>}, {pipeline_mode = #tpu.pipeline_mode<synchronous>, transform_indices = @transform_1, window_bounds = array<i64: 784, 128>}, {pipeline_mode = #tpu.pipeline_mode<synchronous>, transform_indices = @transform_2, window_bounds = array<i64: 1, 128>}, {pipeline_mode = #tpu.pipeline_mode<synchronous>, transform_indices = @transform_3, window_bounds = array<i64: 1, 128>}, {pipeline_mode = #tpu.pipeline_mode<synchronous>, transform_indices = @transform_4, window_bounds = array<i64: 1, 128>}, {transform_indices = @transform_5, window_bounds = array<i64: 8, 128>}, {transform_indices = @transform_6, window_bounds = array<i64: 8, 1>}]} {
    %c0 = arith.constant 0 : index
    %c0_0 = arith.constant 0 : index
    %0 = vector.load %arg1[%c0, %c0_0] : memref<8x784xf32, #tpu.memory_space<vmem>>, vector<8x784xf32>
    %c0_1 = arith.constant 0 : index
    %c0_2 = arith.constant 0 : index
    %1 = vector.load %arg2[%c0_1, %c0_2] : memref<784x128xf32, #tpu.memory_space<vmem>>, vector<784x128xf32>
    %cst = arith.constant dense<0.000000e+00> : vector<8x128xf32>
    %2 = tpu.matmul %0, %1, %cst {dimension_numbers = #tpu.dot_dimension_numbers<[1], [0], [0], [1], [0, 0, 1, 1], [], []>} : vector<8x784xf32>, vector<784x128xf32>, vector<8x128xf32> -> vector<8x128xf32>
    %c0_3 = arith.constant 0 : index
    %c0_4 = arith.constant 0 : index
    %3 = vector.load %arg3[%c0_3, %c0_4] : memref<1x128xf32, #tpu.memory_space<vmem>>, vector<1x128xf32>
    %4 = vector.broadcast %3 : vector<1x128xf32> to vector<8x128xf32>
    %5 = arith.mulf %2, %4 : vector<8x128xf32>
    %c0_5 = arith.constant 0 : index
    %c0_6 = arith.constant 0 : index
    %6 = vector.load %arg4[%c0_5, %c0_6] : memref<1x128xf32, #tpu.memory_space<vmem>>, vector<1x128xf32>
    %7 = vector.broadcast %6 : vector<1x128xf32> to vector<8x128xf32>
    %8 = arith.addf %5, %7 : vector<8x128xf32>
    %9 = math.tanh %8 : vector<8x128xf32>
    %c0_7 = arith.constant 0 : index
    %c0_8 = arith.constant 0 : index
    %10 = vector.load %arg6[%c0_7, %c0_8] : memref<8x128xf32, #tpu.memory_space<vmem>>, vector<8x128xf32>
    tpu.vector_store %arg6[%c0_7, %c0_8], %9 {strides = array<i32>} : memref<8x128xf32, #tpu.memory_space<vmem>>, vector<8x128xf32>,
    %11 = arith.mulf %9, %9 : vector<8x128xf32>
    %cst_9 = arith.constant 9.99999974E-5 : f32
    %12 = vector.broadcast %cst_9 : f32 to vector<8x128xf32>
    %13 = arith.addf %11, %12 : vector<8x128xf32>
    %14 = math.log %13 : vector<8x128xf32>
    %cst_10 = arith.constant -2.99573231 : f32
    %15 = vector.broadcast %cst_10 : f32 to vector<8x128xf32>
    %16 = arith.subf %15, %14 : vector<8x128xf32>
    %cst_11 = arith.constant 5.010000e-02 : f32
    %17 = vector.broadcast %cst_11 : f32 to vector<8x128xf32>
    %18 = arith.addf %11, %17 : vector<8x128xf32>
    %19 = math.log %18 : vector<8x128xf32>
    %cst_12 = arith.constant -2.99573231 : f32
    %20 = vector.broadcast %cst_12 : f32 to vector<8x128xf32>
    %21 = arith.subf %19, %20 : vector<8x128xf32>
    %cst_13 = arith.constant 1.486950e+00 : f32
    %22 = vector.broadcast %cst_13 : f32 to vector<8x128xf32>
    %23 = arith.mulf %22, %16 : vector<8x128xf32>
    %cst_14 = arith.constant 1.873200e+00 : f32
    %24 = vector.broadcast %cst_14 : f32 to vector<8x128xf32>
    %25 = arith.addf %24, %23 : vector<8x128xf32>
    %26 = arith.negf %25 : vector<8x128xf32>
    %27 = math.exp %26 : vector<8x128xf32>
    %cst_15 = arith.constant 1.000000e+00 : f32
    %28 = vector.broadcast %cst_15 : f32 to vector<8x128xf32>
    %29 = arith.addf %28, %27 : vector<8x128xf32>
    %30 = arith.divf %28, %29 : vector<8x128xf32>
    %cst_16 = arith.constant 6.357600e-01 : f32
    %31 = vector.broadcast %cst_16 : f32 to vector<8x128xf32>
    %32 = arith.mulf %31, %30 : vector<8x128xf32>
    %cst_17 = arith.constant 5.000000e-01 : f32
    %33 = vector.broadcast %cst_17 : f32 to vector<8x128xf32>
    %34 = arith.mulf %33, %21 : vector<8x128xf32>
    %35 = arith.subf %32, %34 : vector<8x128xf32>
    %cst_18 = arith.constant 6.357600e-01 : f32
    %36 = vector.broadcast %cst_18 : f32 to vector<8x128xf32>
    %37 = arith.subf %35, %36 : vector<8x128xf32>
    %c0_19 = arith.constant 0 : index
    %c0_20 = arith.constant 0 : index
    %38 = vector.load %arg5[%c0_19, %c0_20] : memref<1x128xf32, #tpu.memory_space<vmem>>, vector<1x128xf32>
    %39 = vector.broadcast %38 : vector<1x128xf32> to vector<8x128xf32>
    %40 = arith.mulf %37, %39 : vector<8x128xf32>
    %cst_21 = arith.constant dense<0.000000e+00> : vector<8xf32>
    %41 = vector.multi_reduction <add>, %40, %cst_21 [1] : vector<8x128xf32> to vector<8xf32>
    %42 = vector.shape_cast %41 : vector<8xf32> to vector<8x1xf32>
    %c0_22 = arith.constant 0 : index
    %c0_23 = arith.constant 0 : index
    %43 = vector.load %arg7[%c0_22, %c0_23] : memref<8x1xf32, #tpu.memory_space<vmem>>, vector<8x1xf32>
    tpu.vector_store %arg7[%c0_22, %c0_23], %42 {strides = array<i32>} : memref<8x1xf32, #tpu.memory_space<vmem>>, vector<8x1xf32>,
    return
  }
  func.func @transform_0(%arg0: i32) -> (i32, i32) {
    %c0_i32 = arith.constant 0 : i32
    %c0_i32_0 = arith.constant 0 : i32
    return %arg0, %c0_i32 : i32, i32
  }
  func.func @transform_1(%arg0: i32) -> (i32, i32) {
    %c0_i32 = arith.constant 0 : i32
    %c0_i32_0 = arith.constant 0 : i32
    %c0_i32_1 = arith.constant 0 : i32
    return %c0_i32, %c0_i32_0 : i32, i32
  }
  func.func @transform_2(%arg0: i32) -> (i32, i32) {
    %c0_i32 = arith.constant 0 : i32
    %c0_i32_0 = arith.constant 0 : i32
    %c0_i32_1 = arith.constant 0 : i32
    return %c0_i32, %c0_i32_0 : i32, i32
  }
  func.func @transform_3(%arg0: i32) -> (i32, i32) {
    %c0_i32 = arith.constant 0 : i32
    %c0_i32_0 = arith.constant 0 : i32
    %c0_i32_1 = arith.constant 0 : i32
    return %c0_i32, %c0_i32_0 : i32, i32
  }
  func.func @transform_4(%arg0: i32) -> (i32, i32) {
    %c0_i32 = arith.constant 0 : i32
    %c0_i32_0 = arith.constant 0 : i32
    %c0_i32_1 = arith.constant 0 : i32
    return %c0_i32, %c0_i32_0 : i32, i32
  }
  func.func @transform_5(%arg0: i32) -> (i32, i32) {
    %c0_i32 = arith.constant 0 : i32
    %c0_i32_0 = arith.constant 0 : i32
    return %arg0, %c0_i32 : i32, i32
  }
  func.func @transform_6(%arg0: i32) -> (i32, i32) {
    %c0_i32 = arith.constant 0 : i32
    %c0_i32_0 = arith.constant 0 : i32
    return %arg0, %c0_i32 : i32, i32
  }
}

</mosaic_0001>

<bundles_post_ra>
// kernel: tpu_custom_call.1
= control target key start
LH: loop header
LB: loop body
LE: loop exit
PB: predicated region body
PF: predicated region fallthrough
CT: control target
= control target key end

     0   :  { %12 = vsyncpa [#allocation3], 0  ;;  %s939_s0 = inlined_call_operand.hbm [shape: f32[2,784], index: 0, kind: input, shape index: {}]   ;;  %s940_s1 = inlined_call_operand.hbm [shape: f32[784,128], index: 1, kind: input, shape index: {}]   ;;  %s941_s2 = inlined_call_operand.vmem [shape: f32[1,128], index: 2, kind: input, shape index: {}]   ;;  %s942_s3 = inlined_call_operand.vmem [shape: f32[1,128], index: 3, kind: input, shape index: {}]   ;;  %s943_s4 = inlined_call_operand.vmem [shape: f32[1,128], index: 4, kind: input, shape index: {}]   ;;  %s944_s5 = inlined_call_operand.hbm [shape: f32[2,128], index: 5, kind: output, shape index: {0}]   ;;  %s945_s6 = inlined_call_operand.vmem [shape: f32[2,1], index: 6, kind: output, shape index: {1}]  }
   0x1   :  { %13 = vsyncpa [#allocation6], 0 }
   0x2   :  { %14 = vsyncpa [#allocation4], 0 }
   0x3   :  { %19 = vsyncadd [#allocation3], 672  ;;  %s857_s21 = smov [#allocation2]  }
   0x4   :  { %s20_s22 = sshll.u32 %s857_s21, 4  ;;  %s21_s22 = int_to_ptr.vmem [resolvable:$true] %s20_s22 }
   0x5   :  { %s799_s23 = scalar_lea.vmem %s21_s22, 224  ;;  %s803_s24 = scalar_lea.vmem %s21_s22, 896 }
   0x6   :  { %p800_p0 = scmp.ne.s32.totalorder %s21_s22, %s799_s23  ;;  %p804_p1 = scmp.lt.s32.totalorder %s21_s22, %s21_s22 }
   0x7   :  { %p805_p2 = scmp.lt.s32.totalorder %s803_s24, %s799_s23 }
   0x9   :  { %p806_p3 = por %p805_p2, %p804_p1 }
   0xb   :  { %p807_p4 = pnand %p806_p3, %p800_p0 }
   0xd   :  { %810 = shalt.err (!%p807_p4)
}
   0xe   :  { %s858_s25 = smov 224   ;;  %s859_s26 = smov 14  }
   0xf   :  { %26 = dma.hbm_to_vmem [thread:$0]  %s939_s0, 224, %s21_s22, [#allocation3], %s858_s25, %s858_s25, %s859_s26  }
  0x10   :  { %s860_s29 = smov [#allocation5]  }
  0x11   :  { %s32_s30 = sshll.u32 %s860_s29, 4  ;;  %s33_s30 = int_to_ptr.vmem [resolvable:$true] %s32_s30 }
  0x12   :  { %s819_s7 = scalar_lea.vmem %s33_s30, 12544  ;;  %p824_p6 = scmp.lt.s32.totalorder %s33_s30, %s33_s30 }
  0x13   :  { %p820_p5 = scmp.ne.s32.totalorder %s33_s30, %s819_s7  ;;  %p825_p7 = scmp.lt.s32.totalorder %s819_s7, %s819_s7 }
  0x15   :  { %p826_p8 = por %p825_p7, %p824_p6 }
  0x17   :  { %p827_p9 = pnand %p826_p8, %p820_p5 }
  0x19   :  { %830 = shalt.err (!%p827_p9)
}
  0x1a   :  { %s861_s8 = smov 128   ;;  %s862_s9 = smov 8  }
  0x1b   :  { %38 = dma.hbm_to_vmem [thread:$0]  %s940_s1, 12544, %s33_s30, [#allocation6], %s861_s8, %s861_s8, %s862_s9  }
  0x1c   :  { %851 = dma.done.wait [#allocation3], 896  }
  0x1d   :  { %852 = vsyncadd [#allocation3], 4294966400 }
  0x1e   :  { %853 = dma.done.wait [#allocation6], 12544  }
  0x1f   :  { %854 = vsyncadd [#allocation6], 4294954752  ;;  %v90_v0 = vld [vmem:[#allocation5 + $0xf8] sm:$0xff]  ;;  %v89_v4 = vld [vmem:[#allocation5 + $0xf0] sm:$0xff]  ;;  %v863_v30 = vmov 1983009808   ;;  %v172_v32 = vlaneseq }
  0x20   :  { %v122_v1 = vld [vmem:[#allocation5 + $0x1f8] sm:$0xff]  ;;  %642 = vmatprep.subr.mxu0 %v90_v0  ;;  %v121_v5 = vld [vmem:[#allocation5 + $0x1f0] sm:$0xff]  ;;  %v88_v8 = vld [vmem:[#allocation5 + $0xe8] sm:$0xff]  ;;  %v170_v31 = vunpack.c.l.s4 %v863_v30  ;;  %vm865_vm0 = vmmov 0   ;;  %vm242_vm1 = vcmask 130048   ;;  %vm574_vm2 = vcmask 7168  }
  0x21   :  { %v74_v2 = vld [vmem:[#allocation5 + $0x78] sm:$0xff]  ;;  %677 = vmatprep.subr.mxu1 %v122_v1  ;;  %v73_v6 = vld [vmem:[#allocation5 + $0x70] sm:$0xff]  ;;  %v120_v9 = vld [vmem:[#allocation5 + $0x1e8] sm:$0xff]  ;;  %v173_v42 = vshrl.u32 %v172_v32, 7 }
  0x22   :  { %v106_v3 = vld [vmem:[#allocation5 + $0x178] sm:$0xff]  ;;  %643 = vmatpush3.msra.mxu0 %v74_v2  ;;  %v105_v7 = vld [vmem:[#allocation5 + $0x170] sm:$0xff]  ;;  %v72_v10 = vld [vmem:[#allocation5 + $0x68] sm:$0xff]  ;;  %v171_v41 = vunpack.c.0.s8 %v170_v31 }
  0x23   :  { %678 = vmatpush3.msra.mxu1 %v106_v3  ;;  %644 = vmatprep.subr.mxu0 %v89_v4  ;;  %v104_v11 = vld [vmem:[#allocation5 + $0x168] sm:$0xff]  ;;  %v87_v12 = vld [vmem:[#allocation5 + $0xe0] sm:$0xff]  ;;  %v86_v16 = vld [vmem:[#allocation5 + $0xd8] sm:$0xff] }
  0x24   :  { %679 = vmatprep.subr.mxu1 %v121_v5  ;;  %645 = vmatpush3.msra.mxu0 %v73_v6  ;;  %v119_v13 = vld [vmem:[#allocation5 + $0x1e0] sm:$0xff]  ;;  %v118_v17 = vld [vmem:[#allocation5 + $0x1d8] sm:$0xff]  ;;  %v85_v20 = vld [vmem:[#allocation5 + $0xd0] sm:$0xff]  ;;  %v910_v55 = vsub.s32 %v171_v41, %v173_v42 }
  0x25   :  { %680 = vmatpush3.msra.mxu1 %v105_v7  ;;  %646 = vmatprep.subr.mxu0 %v88_v8  ;;  %v71_v14 = vld [vmem:[#allocation5 + $0x60] sm:$0xff]  ;;  %v70_v18 = vld [vmem:[#allocation5 + $0x58] sm:$0xff]  ;;  %v117_v21 = vld [vmem:[#allocation5 + $0x1d0] sm:$0xff] }
  0x26   :  { %681 = vmatprep.subr.mxu1 %v120_v9  ;;  %v103_v15 = vld [vmem:[#allocation5 + $0x160] sm:$0xff]  ;;  %647 = vmatpush3.msra.mxu0 %v72_v10  ;;  %v102_v19 = vld [vmem:[#allocation5 + $0x158] sm:$0xff]  ;;  %v69_v22 = vld [vmem:[#allocation5 + $0x50] sm:$0xff] }
  0x27   :  { %682 = vmatpush3.msra.mxu1 %v104_v11  ;;  %648 = vmatprep.subr.mxu0 %v87_v12  ;;  %v101_v23 = vld [vmem:[#allocation5 + $0x150] sm:$0xff]  ;;  %v84_v24 = vld [vmem:[#allocation5 + $0xc8] sm:$0xff]  ;;  %v83_v28 = vld [vmem:[#allocation5 + $0xc0] sm:$0xff] }
  0x28   :  { %683 = vmatprep.subr.mxu1 %v119_v13  ;;  %649 = vmatpush3.msra.mxu0 %v71_v14  ;;  %v116_v25 = vld [vmem:[#allocation5 + $0x1c8] sm:$0xff]  ;;  %v115_v29 = vld [vmem:[#allocation5 + $0x1c0] sm:$0xff]  ;;  %v82_v35 = vld [vmem:[#allocation5 + $0xb8] sm:$0xff] }
  0x29   :  { %684 = vmatpush3.msra.mxu1 %v103_v15  ;;  %650 = vmatprep.subr.mxu0 %v86_v16  ;;  %v68_v26 = vld [vmem:[#allocation5 + $0x48] sm:$0xff]  ;;  %v67_v33 = vld [vmem:[#allocation5 + $0x40] sm:$0xff]  ;;  %v114_v36 = vld [vmem:[#allocation5 + $0x1b8] sm:$0xff] }
  0x2a   :  { %685 = vmatprep.subr.mxu1 %v118_v17  ;;  %651 = vmatpush3.msra.mxu0 %v70_v18  ;;  %v100_v27 = vld [vmem:[#allocation5 + $0x148] sm:$0xff]  ;;  %v99_v34 = vld [vmem:[#allocation5 + $0x140] sm:$0xff]  ;;  %v66_v37 = vld [vmem:[#allocation5 + $0x38] sm:$0xff] }
  0x2b   :  { %686 = vmatpush3.msra.mxu1 %v102_v19  ;;  %652 = vmatprep.subr.mxu0 %v85_v20  ;;  %v98_v38 = vld [vmem:[#allocation5 + $0x138] sm:$0xff]  ;;  %v81_v39 = vld [vmem:[#allocation5 + $0xb0] sm:$0xff]  ;;  %v80_v45 = vld [vmem:[#allocation5 + $0xa8] sm:$0xff] }
  0x2c   :  { %687 = vmatprep.subr.mxu1 %v117_v21  ;;  %653 = vmatpush3.msra.mxu0 %v69_v22  ;;  %v113_v40 = vld [vmem:[#allocation5 + $0x1b0] sm:$0xff]  ;;  %v112_v46 = vld [vmem:[#allocation5 + $0x1a8] sm:$0xff]  ;;  %v79_v49 = vld [vmem:[#allocation5 + $0xa0] sm:$0xff] }
  0x2d   :  { %688 = vmatpush3.msra.mxu1 %v101_v23  ;;  %654 = vmatprep.subr.mxu0 %v84_v24  ;;  %v65_v43 = vld [vmem:[#allocation5 + $0x30] sm:$0xff]  ;;  %v64_v47 = vld [vmem:[#allocation5 + $0x28] sm:$0xff]  ;;  %v111_v50 = vld [vmem:[#allocation5 + $0x1a0] sm:$0xff]  ;;  %v864_v24 = vmov 0.0  }
  0x2e   :  { %689 = vmatprep.subr.mxu1 %v116_v25  ;;  %655 = vmatpush3.msra.mxu0 %v68_v26  ;;  %v97_v44 = vld [vmem:[#allocation5 + $0x130] sm:$0xff]  ;;  %v96_v48 = vld [vmem:[#allocation5 + $0x128] sm:$0xff]  ;;  %v63_v51 = vld [vmem:[#allocation5 + $0x20] sm:$0xff] }
  0x2f   :  { %690 = vmatpush3.msra.mxu1 %v100_v27  ;;  %656 = vmatprep.subr.mxu0 %v83_v28  ;;  %v95_v52 = vld [vmem:[#allocation5 + $0x120] sm:$0xff]  ;;  %v78_v53 = vld [vmem:[#allocation5 + $0x98] sm:$0xff]  ;;  %v77_v62 = vld [vmem:[#allocation5 + $0x90] sm:$0xff] }
  0x30   :  { %691 = vmatprep.subr.mxu1 %v115_v29  ;;  %657 = vmatpush3.msra.mxu0 %v67_v33  ;;  %v110_v54 = vld [vmem:[#allocation5 + $0x198] sm:$0xff]  ;;  %v771_v58 = vld [vmem:[#allocation2 + $0x1c] ss:$14 sps:$4 sm:$0xff]   ;;  %v76_v6 = vld [vmem:[#allocation5 + $0x88] sm:$0xff] }
  0x31   :  { %692 = vmatpush3.msra.mxu1 %v99_v34  ;;  %658 = vmatprep.subr.mxu0 %v82_v35  ;;  %v62_v56 = vld [vmem:[#allocation5 + $0x18] sm:$0xff]  ;;  %v109_v63 = vld [vmem:[#allocation5 + $0x190] sm:$0xff]  ;;  %v189_v1 = vrot.slane %v771_v58, %v910_v55  ;;  %v108_v7 = vld [vmem:[#allocation5 + $0x188] sm:$0xff] }
  0x32   :  { %693 = vmatprep.subr.mxu1 %v114_v36  ;;  %659 = vmatpush3.msra.mxu0 %v66_v37  ;;  %v769_v57 = vld [vmem:[#allocation2] ss:$14 sps:$4 sm:$0xff]   ;;  %v773_v60 = vld [vmem:[#allocation2 + $0x4] ss:$14 sps:$4 sm:$0xff]   ;;  %v75_v10 = vld [vmem:[#allocation5 + $0x80] sm:$0xff] }
  0x33   :  { %694 = vmatpush3.msra.mxu1 %v98_v38  ;;  %660 = vmatprep.subr.mxu0 %v81_v39  ;;  %v94_v59 = vld [vmem:[#allocation5 + $0x118] sm:$0xff]  ;;  %v175_v0 = vrot.slane %v769_v57, %v910_v55  ;;  %v61_v2 = vld [vmem:[#allocation5 + $0x10] sm:$0xff]  ;;  %v182_v4 = vrot.slane %v773_v60, %v910_v55  ;;  %v60_v8 = vld [vmem:[#allocation5 + $0x8] sm:$0xff] }
  0x34   :  { %695 = vmatprep.subr.mxu1 %v113_v40  ;;  %661 = vmatpush3.msra.mxu0 %v65_v43  ;;  %v774_v61 = vld [vmem:[#allocation2 + $0x20] ss:$14 sps:$4 sm:$0xff]   ;;  %v107_v11 = vld [vmem:[#allocation5 + $0x180] sm:$0xff]  ;;  %v778_v28 = vld [vmem:[#allocation2 + $0x24] ss:$14 sps:$4 sm:$0xff]  }
  0x35   :  { %696 = vmatpush3.msra.mxu1 %v97_v44  ;;  %662 = vmatprep.subr.mxu0 %v80_v45  ;;  %v93_v3 = vld [vmem:[#allocation5 + $0x110] sm:$0xff]  ;;  %v196_v5 = vrot.slane %v774_v61, %v910_v55  ;;  %v92_v9 = vld [vmem:[#allocation5 + $0x108] sm:$0xff]  ;;  %v198_v12 = vcombine.high %v175_v0, %v189_v1  ;;  %v59_v13 = vld [vmem:[#allocation5] sm:$0xff]  ;;  %v197_v16 = vcombine.low %v175_v0, %v189_v1 }
  0x36   :  { %697 = vmatprep.subr.mxu1 %v112_v46  ;;  %663 = vmatpush3.msra.mxu0 %v64_v47  ;;  %v91_v15 = vld [vmem:[#allocation5 + $0x100] sm:$0xff]  ;;  %v154_v18 = vld [vmem:[#allocation5 + $0x2f8] sm:$0xff]  ;;  %v153_v20 = vld [vmem:[#allocation5 + $0x2f0] sm:$0xff]  ;;  %v225_v35 = vrot.slane %v778_v28, %v910_v55 }
  0x37   :  { %698 = vmatpush3.msra.mxu1 %v96_v48  ;;  %664 = vmatprep.subr.mxu0 %v79_v49  ;;  %v200_v14 = vcombine.high %v182_v4, %v196_v5  ;;  %v199_v17 = vcombine.low %v182_v4, %v196_v5  ;;  %v138_v19 = vld [vmem:[#allocation5 + $0x278] sm:$0xff]  ;;  %v137_v21 = vld [vmem:[#allocation5 + $0x270] sm:$0xff]  ;;  %v152_v22 = vld [vmem:[#allocation5 + $0x2e8] sm:$0xff] }
  0x38   :  { %699 = vmatprep.subr.mxu1 %v111_v50  ;;  %665 = vmatpush3.msra.mxu0 %v63_v51  ;;  %v136_v23 = vld [vmem:[#allocation5 + $0x268] sm:$0xff]  ;;  %v775_v25 = vld [vmem:[#allocation2 + $0x8] ss:$14 sps:$4 sm:$0xff]   ;;  %v777_v26 = vld [vmem:[#allocation2 + $0xc] ss:$14 sps:$4 sm:$0x33]  }
  0x39   :  { %700 = vmatpush3.msra.mxu1 %v95_v52  ;;  %666 = vmatprep.subr.mxu0 %v78_v53  ;;  %v156_v27 = vld [vmem:[#allocation5 + $0x308] sm:$0xff]  ;;  %v780_v29 = vld [vmem:[#allocation2 + $0x28] ss:$14 sps:$4 sm:$0x33]   ;;  %v155_v30 = vld [vmem:[#allocation5 + $0x300] sm:$0xff]  ;;  %v917_v32 = vrot.slane %v775_v25, %v910_v55  ;;  %v218_v33 = vrot.slane %v777_v26, %v910_v55 }
  0x3a   :  { %701 = vmatprep.subr.mxu1 %v110_v54  ;;  %667 = vmatpush3.msra.mxu0 %v62_v56  ;;  %v151_v31 = vld [vmem:[#allocation5 + $0x2e0] sm:$0xff]  ;;  %v232_v36 = vrot.slane %v780_v29, %v910_v55  ;;  %v150_v37 = vld [vmem:[#allocation5 + $0x2d8] sm:$0xff]  ;;  %v149_v41 = vld [vmem:[#allocation5 + $0x2d0] sm:$0xff] }
  0x3b   :  { %702 = vmatpush3.msra.mxu1 %v94_v59  ;;  %668 = vmatprep.subr.mxu0 %v77_v62  ;;  %v135_v34 = vld [vmem:[#allocation5 + $0x260] sm:$0xff]  ;;  %v134_v38 = vld [vmem:[#allocation5 + $0x258] sm:$0xff]  ;;  %v234_v39 = vcombine.high %v917_v32, %v225_v35  ;;  %v133_v42 = vld [vmem:[#allocation5 + $0x250] sm:$0xff] }
  0x3c   :  { %703 = vmatprep.subr.mxu1 %v109_v63  ;;  %669 = vmatpush3.msra.mxu0 %v61_v2  ;;  %v235_v40 = vcombine.low %v218_v33, %v232_v36  ;;  %v148_v43 = vld [vmem:[#allocation5 + $0x2c8] sm:$0xff]  ;;  %v147_v45 = vld [vmem:[#allocation5 + $0x2c0] sm:$0xff]  ;;  %v146_v47 = vld [vmem:[#allocation5 + $0x2b8] sm:$0xff]  ;;  %v233_v63 = vcombine.low %v917_v32, %v225_v35 }
  0x3d   :  { %704 = vmatpush3.msra.mxu1 %v93_v3  ;;  %670 = vmatprep.subr.mxu0 %v76_v6  ;;  %v132_v44 = vld [vmem:[#allocation5 + $0x248] sm:$0xff]  ;;  %v131_v46 = vld [vmem:[#allocation5 + $0x240] sm:$0xff]  ;;  %v130_v48 = vld [vmem:[#allocation5 + $0x238] sm:$0xff] }
  0x3e   :  { %705 = vmatprep.subr.mxu1 %v108_v7  ;;  %671 = vmatpush3.msra.mxu0 %v60_v8  ;;  %v145_v49 = vld [vmem:[#allocation5 + $0x2b0] sm:$0xff]  ;;  %v144_v51 = vld [vmem:[#allocation5 + $0x2a8] sm:$0xff]  ;;  %v143_v53 = vld [vmem:[#allocation5 + $0x2a0] sm:$0xff] }
  0x3f   :  { %706 = vmatpush3.msra.mxu1 %v92_v9  ;;  %672 = vmatprep.subr.mxu0 %v75_v10  ;;  %v129_v50 = vld [vmem:[#allocation5 + $0x230] sm:$0xff]  ;;  %v128_v52 = vld [vmem:[#allocation5 + $0x228] sm:$0xff]  ;;  %v127_v54 = vld [vmem:[#allocation5 + $0x220] sm:$0xff] }
  0x40   :  { %707 = vmatprep.subr.mxu1 %v107_v11  ;;  %673 = vmatpush3.msra.mxu0 %v59_v13  ;;  %v142_v55 = vld [vmem:[#allocation5 + $0x298] sm:$0xff]  ;;  %v141_v57 = vld [vmem:[#allocation5 + $0x290] sm:$0xff]  ;;  %v140_v59 = vld [vmem:[#allocation5 + $0x288] sm:$0xff] }
  0x41   :  { %309 = vmatprep.mubr.f32.mxu0 %v198_v12  ;;  %708 = vmatpush3.msra.mxu1 %v91_v15  ;;  %v126_v56 = vld [vmem:[#allocation5 + $0x218] sm:$0xff]  ;;  %v125_v58 = vld [vmem:[#allocation5 + $0x210] sm:$0xff]  ;;  %v124_v60 = vld [vmem:[#allocation5 + $0x208] sm:$0xff] }
  0x42   :  { %379 = vmatprep.mubr.f32.mxu1 %v200_v14  ;;  %310 = vmatmul.mubr.f32.vlgmr.msra.gmra.mxu0 %v197_v16  ;;  %v139_v61 = vld [vmem:[#allocation5 + $0x280] sm:$0xff]  ;;  %v636_v13 = vld [vmem:[%s941_s2] ss:$0 sm:$0xff] }
  0x43   :  { %380 = vmatmul.mubr.f32.vlgmr.msra.gmra.mxu1 %v199_v17  ;;  %712 = vmatprep.subr.mxu0 %v154_v18  ;;  %v123_v62 = vld [vmem:[#allocation5 + $0x200] sm:$0xff]  ;;  %v637_v15 = vld [vmem:[%s942_s3] ss:$0 sm:$0xff] }
  0x44   :  { %750 = vmatprep.subr.mxu1 %v864_v24  ;;  %713 = vmatpush3.msra.mxu0 %v138_v19 }
  0x45   :  { %754 = vmatprep.mubr.msk.f32.mxu1 %vm865_vm0, %v864_v24  ;;  %714 = vmatprep.subr.mxu0 %v153_v20 }
  0x46   :  { %751 = vmatpush3.msra.mxu1 %v156_v27  ;;  %715 = vmatpush3.msra.mxu0 %v137_v21 }
  0x47   :  { %752 = vmatprep.subr.mxu1 %v864_v24  ;;  %716 = vmatprep.subr.mxu0 %v152_v22 }
  0x48   :  { %753 = vmatpush3.msra.mxu1 %v155_v30  ;;  %717 = vmatpush3.msra.mxu0 %v136_v23 }
  0x49   :  { %718 = vmatprep.subr.mxu0 %v151_v31  ;;  %449 = vmatprep.mubr.f32.mxu0 %v234_v39 }
  0x4a   :  { %719 = vmatpush3.msra.mxu0 %v135_v34  ;;  %755 = vmatmul.mubr.msk.f32.vlgmr.msra.gmra.mxu1 %vm242_vm1, %v235_v40 }
  0x4b   :  { %720 = vmatprep.subr.mxu0 %v150_v37  ;;  %v641_v37 = vld [vmem:[%s943_s4] ss:$0 sm:$0xff] }
  0x4c   :  { %721 = vmatpush3.msra.mxu0 %v134_v38 }
  0x4d   :  { %722 = vmatprep.subr.mxu0 %v149_v41 }
  0x4e   :  { %723 = vmatpush3.msra.mxu0 %v133_v42 }
  0x4f   :  { %724 = vmatprep.subr.mxu0 %v148_v43 }
  0x50   :  { %725 = vmatpush3.msra.mxu0 %v132_v44 }
  0x51   :  { %726 = vmatprep.subr.mxu0 %v147_v45 }
  0x52   :  { %727 = vmatpush3.msra.mxu0 %v131_v46 }
  0x53   :  { %728 = vmatprep.subr.mxu0 %v146_v47 }
  0x54   :  { %729 = vmatpush3.msra.mxu0 %v130_v48 }
  0x55   :  { %730 = vmatprep.subr.mxu0 %v145_v49 }
  0x56   :  { %731 = vmatpush3.msra.mxu0 %v129_v50 }
  0x57   :  { %732 = vmatprep.subr.mxu0 %v144_v51 }
  0x58   :  { %733 = vmatpush3.msra.mxu0 %v128_v52 }
  0x59   :  { %734 = vmatprep.subr.mxu0 %v143_v53 }
  0x5a   :  { %735 = vmatpush3.msra.mxu0 %v127_v54 }
  0x5b   :  { %736 = vmatprep.subr.mxu0 %v142_v55 }
  0x5c   :  { %737 = vmatpush3.msra.mxu0 %v126_v56 }
  0x5d   :  { %738 = vmatprep.subr.mxu0 %v141_v57 }
  0x5e   :  { %739 = vmatpush3.msra.mxu0 %v125_v58 }
  0x5f   :  { %740 = vmatprep.subr.mxu0 %v140_v59 }
  0x60   :  { %741 = vmatpush3.msra.mxu0 %v124_v60 }
  0x61   :  { %742 = vmatprep.subr.mxu0 %v139_v61 }
  0x62   :  { %743 = vmatpush3.msra.mxu0 %v123_v62 }
  0x63   :  { %450 = vmatmul.mubr.f32.vlgmr.msra.gmra.mxu0 %v233_v63 }
 0x102   :  { %v674_v4 = vpop.f32.mrf.mxu0 }
 0x103   :  { %v709_v0 = vpop.f32.mrf.mxu1 }
 0x104   :  { %v675_v5 = vpop.f32.mrf.mxu0 }
 0x105   :  { %v710_v1 = vpop.f32.mrf.mxu1  ;;  %v676_v6 = vadd.f32 %v675_v5, %v674_v4 }
 0x106   :  { %v711_v7 = vadd.f32 %v710_v1, %v709_v0 }
 0x108   :  { %v382_v10 = vadd.f32 %v711_v7, %v676_v6 }
 0x10a   :  { %v521_v2 = vpop.f32.mrf.mxu1 }
 0x10c   :  { %v756_v3 = vpop.f32.mrf.mxu1 }
 0x123   :  { %v744_v8 = vpop.f32.mrf.mxu0 }
 0x125   :  { %v745_v9 = vpop.f32.mrf.mxu0 }
 0x126   :  { %v746_v11 = vadd.f32 %v745_v9, %v744_v8 }
 0x128   :  { %v452_v12 = vadd.f32 %v746_v11, %v382_v10 }
 0x12a   :  { %v522_v14 = vadd.f32 %v521_v2, %v452_v12 }
 0x12c   :  { %v532_v16 = vmul.f32 %v636_v13, %v522_v14 }
 0x12e   :  { %v540_v17 = vadd.f32 %v637_v15, %v532_v16 }
 0x130   :  { %781 = vtanh.f32 %v540_v17 }
 0x13d   :  { %v782_v18 = vpop.eup %781 }
 0x13e   :  { %542 = vst [vmem:[#allocation7] sm:$0xff] %v782_v18  ;;  %v543_v19 = vmul.f32 %v782_v18, %v782_v18 }
 0x140   :  { %v544_v20 = vadd.f32 0.0001, %v543_v19  ;;  %v548_v27 = vadd.f32 0.0501, %v543_v19 }
 0x142   :  { %783 = vlog2.f32 %v544_v20 }
 0x14f   :  { %v784_v21 = vpop.eup %783 }
 0x150   :  { %v546_v22 = vmul.f32 0.6931472, %v784_v21 }
 0x152   :  { %v547_v23 = vsub.f32 -2.9957323, %v546_v22 }
 0x154   :  { %v552_v24 = vmul.f32 1.48695, %v547_v23 }
 0x156   :  { %v553_v25 = vadd.f32 1.8732, %v552_v24 }
 0x158   :  { %v639_v26 = vmul.f32 -1.442695, %v553_v25 }
 0x15a   :  { %785 = vpow2.f32 %v639_v26 }
 0x15b   :  { %787 = vlog2.f32 %v548_v27 }
 0x167   :  { %v786_v28 = vpop.eup %785 }
 0x168   :  { %v557_v29 = vadd.f32 1.0, %v786_v28  ;;  %v788_v30 = vpop.eup %787 }
 0x169   :  { %v550_v31 = vmul.f32 0.6931472, %v788_v30 }
 0x16a   :  { %789 = vrcp.f32 %v557_v29 }
 0x16b   :  { %v638_v32 = vadd.f32 2.9957323, %v550_v31 }
 0x16d   :  { %v561_v35 = vmul.f32 0.5, %v638_v32 }
 0x177   :  { %v790_v33 = vpop.eup %789 }
 0x178   :  { %v560_v34 = vmul.f32 0.63576, %v790_v33 }
 0x17a   :  { %v562_v36 = vsub.f32 %v560_v34, %v561_v35 }
 0x17c   :  { %v640_v38 = vadd.f32 -0.63576, %v562_v36 }
 0x17e   :  { %v571_v39 = vmul.f32 %v641_v37, %v640_v38 }
 0x180   :  { %572 = vadd.xlane.f32.xlu0 %v571_v39 }
 0x209   :  { %v573_v40 = vpop.xlane.xlu0 %572 }
 0x20a   :  { %575 = vst.msk [vmem:[#allocation8] sm:$0xff] %vm574_vm2, %v573_v40 }
 0x20b   :  { %580 = vsyncadd [#allocation4], 96  ;;  %s866_s14 = smov [#allocation7]  }
 0x20c   :  { %s581_s15 = sshll.u32 %s866_s14, 4  ;;  %s582_s15 = int_to_ptr.vmem [resolvable:$true] %s581_s15 }
 0x20d   :  { %s831_s18 = scalar_lea.vmem %s582_s15, 32  ;;  %s835_s19 = scalar_lea.vmem %s582_s15, 128 }
 0x20e   :  { %p832_p10 = scmp.ne.s32.totalorder %s582_s15, %s831_s18  ;;  %p836_p11 = scmp.lt.s32.totalorder %s582_s15, %s582_s15 }
 0x20f   :  { %p837_p12 = scmp.lt.s32.totalorder %s835_s19, %s831_s18 }
 0x211   :  { %v606_v41 = vld [vmem:[#allocation8] sm:$0x3]  ;;  %p838_p13 = por %p837_p12, %p836_p11 }
 0x212   :  { %607 = vst [vmem:[%s945_s6] sm:$0x3] %v606_v41 }
 0x213   :  { %p839_p0 = pnand %p838_p13, %p832_p10 }
 0x215   :  { %842 = shalt.err (!%p839_p0)
}
 0x216   :  { %s867_s4 = smov 32   ;;  %s868_s20 = smov 2  }
 0x217   :  { %587 = dma.vmem_to_hbm [thread:$0]  %s582_s15, 32, %s944_s5, [#allocation4], %s867_s4, %s867_s4, %s868_s20  }
 0x218   :  { %855 = dma.done.wait [#allocation4], 128  }
 0x219   :  { %856 = vsyncadd [#allocation4], 4294967168 }
 0x21a   :  { %628 = vsyncpa [#allocation3], 1 }
 0x21b   :  { %629 = vsyncpa [#allocation6], 1 }
 0x21c   :  { %630 = vsyncpa [#allocation4], 1 }

</bundles_post_ra>
